<compile_context>
chip_gen: v6e
topology: v6e:2x2x1
jax: 0.10.0
libtpu: 0.0.40
codegen_flags: <defaults>
</compile_context>

<pallas_src>
import functools

import jax
import jax.numpy as jnp
from jax.experimental import pallas as pl
from jax.experimental.pallas import tpu as pltpu

_NEG_LARGE = -1e30  # finite mask fill (avoids NaN weights on fully-masked rows)


def _bahdanau_kernel(lens_ref,                      # SMEM [B] int32 (scalar prefetch)
                     enc_ref, dec_ref,              # [BB*T, E] bf16, [BB, 1, D] bf16
                     w_enc_ref, b_enc_ref,          # [E, H] bf16, [1, H] f32
                     w_dec_ref, w_v_ref, b_w_ref,   # [D, H] bf16, [1, H] f32, SMEM [1,1] f32
                     ctx_ref, attw_ref,             # [BB, 1, E] f32, [BB, 1, T] f32
                     *, block_batch, seq_len):
    BB, T = block_batch, seq_len
    base = pl.program_id(0) * BB

    enc = enc_ref[...]                                                  # [BB*T, E] bf16
    # processed_memory = mlp_enc(encoder_outs): one MXU matmul over all BB*T rows.
    pm = jnp.dot(enc, w_enc_ref[...],
                 preferred_element_type=jnp.float32) + b_enc_ref[...]   # [BB*T, H] f32

    wv = w_v_ref[...]                                                   # [1, H] f32
    bw = b_w_ref[0, 0]                                                  # scalar
    t_idx = jax.lax.broadcasted_iota(jnp.int32, (1, T), 1)              # [1, T]

    for b in range(BB):                                                 # static unroll
        # decoder query = mlp_dec(decoder_state) (no bias), broadcast over time.
        dq = jnp.dot(dec_ref[b], w_dec_ref[...],
                     preferred_element_type=jnp.float32)                # [1, H]
        th = jnp.tanh(pm[b * T:(b + 1) * T, :] + dq)                    # [T, H]
        # erg = w(tanh(...)) as a lane-dense [1, T] row (contract over H).
        e = jnp.einsum('oh,th->ot', wv, th,
                       preferred_element_type=jnp.float32) + bw         # [1, T]
        # masked_fill(mask, -inf): positions t >= src_len are padding.
        e = jnp.where(t_idx >= lens_ref[base + b], _NEG_LARGE, e)
        # softmax over time (lane axis -> lane-dense reductions).
        m = jnp.max(e, axis=-1, keepdims=True)
        p = jnp.exp(e - m)
        w_row = p * pl.reciprocal(jnp.sum(p, axis=-1, keepdims=True), approx=True)
        # attention_context = weights @ encoder_outs  (MXU, lane-dense [1, E] out).
        ctx_ref[b] = jnp.dot(w_row.astype(enc.dtype), enc[b * T:(b + 1) * T, :],
                             preferred_element_type=jnp.float32).astype(ctx_ref.dtype)
        attw_ref[b] = w_row.astype(attw_ref.dtype)


def _pick_block_batch(B, T):
    """Batch rows folded per grid step: aim for ~128 MXU rows (BB*T) while keeping
    at least two grid steps when the batch allows it (megacore sharding)."""
    best = 1
    for bb in range(1, B + 1):
        if B % bb != 0 or (bb * T) % 8 != 0:
            continue
        if bb * T <= 128 and B // bb >= min(2, B):
            best = max(best, bb)
    return best


def bahdanau_attention(encoder_outs, src_lens, decoder_state, params,
                       *, block_batch=None):
    B, T, E = encoder_outs.shape
    D = decoder_state.shape[-1]
    H = params["w_enc"].shape[-1]

    # Pad time so the flattened [B*T, E] block stays sublane-aligned; padded
    # positions are masked out in-kernel because t >= src_len.
    T_pad = -(-T // 8) * 8
    if T_pad != T:
        encoder_outs = jnp.pad(encoder_outs, ((0, 0), (0, T_pad - T), (0, 0)))

    BB = block_batch if block_batch is not None else _pick_block_batch(B, T_pad)
    assert B % BB == 0 and (BB * T_pad) % 8 == 0

    lens = src_lens.astype(jnp.int32).reshape(B)
    enc_flat = encoder_outs.reshape(B * T_pad, E).astype(jnp.bfloat16)
    dec3 = decoder_state.reshape(B, 1, D).astype(jnp.bfloat16)
    w_enc = params["w_enc"].astype(jnp.bfloat16)                  # [E, H]
    b_enc = params["b_enc"].astype(jnp.float32).reshape(1, H)     # [1, H]
    w_dec = params["w_dec"].astype(jnp.bfloat16)                  # [D, H]
    w_v = params["w_v"].astype(jnp.float32).reshape(1, H)         # [H,1] -> [1,H]
    b_w = params["b_w"].astype(jnp.float32).reshape(1, 1)         # [1, 1]

    kernel = functools.partial(_bahdanau_kernel, block_batch=BB, seq_len=T_pad)

    ctx, attw = pl.pallas_call(
        kernel,
        out_shape=(jax.ShapeDtypeStruct((B, 1, E), jnp.float32),
                   jax.ShapeDtypeStruct((B, 1, T_pad), jnp.float32)),
        grid_spec=pltpu.PrefetchScalarGridSpec(
            num_scalar_prefetch=1,
            grid=(B // BB,),
            in_specs=[
                pl.BlockSpec((BB * T_pad, E), lambda b, sl: (b, 0)),     # encoder (flat)
                pl.BlockSpec((BB, 1, D), lambda b, sl: (b, 0, 0)),       # decoder state
                pl.BlockSpec((E, H), lambda b, sl: (0, 0)),              # W_enc
                pl.BlockSpec((1, H), lambda b, sl: (0, 0)),              # b_enc
                pl.BlockSpec((D, H), lambda b, sl: (0, 0)),              # W_dec
                pl.BlockSpec((1, H), lambda b, sl: (0, 0)),              # w_v (row)
                pl.BlockSpec(memory_space=pltpu.MemorySpace.SMEM),       # b_w scalar
            ],
            out_specs=(pl.BlockSpec((BB, 1, E), lambda b, sl: (b, 0, 0)),
                       pl.BlockSpec((BB, 1, T_pad), lambda b, sl: (b, 0, 0))),
        ),
        compiler_params=pltpu.CompilerParams(
            dimension_semantics=("parallel",)),
    )(lens, enc_flat, dec3, w_enc, b_enc, w_dec, w_v, b_w)

    return ctx.reshape(B, E), attw.reshape(B, T_pad)[:, :T]


def reference(encoder_outs, src_lens, decoder_state, params):
    T = encoder_outs.shape[1]
    mask = jnp.arange(T)[None, :] >= src_lens[:, None]
    pm = encoder_outs @ params["w_enc"] + params["b_enc"]
    dq = decoder_state @ params["w_dec"]
    erg = jnp.squeeze(jnp.tanh(pm + dq[:, None, :]) @ params["w_v"], -1) + params["b_w"][0, 0]
    erg = jnp.where(mask, -jnp.inf, erg)
    w = jax.nn.softmax(erg, axis=1)
    ctx = jnp.sum(encoder_outs * w[..., None], axis=1)
    return ctx, w


if __name__ == "__main__":
    B, T, E, D, H = 2, 16, 128, 128, 128

    key = jax.random.PRNGKey(0)
    k_enc, k_dec, k_we, k_be, k_wd, k_wv, k_bw = jax.random.split(key, 7)

    encoder_outs = jax.random.normal(k_enc, (B, T, E), dtype=jnp.float32)
    decoder_state = jax.random.normal(k_dec, (B, D), dtype=jnp.float32)
    src_lens = jnp.array([T, 10], dtype=jnp.int32)

    scale = 0.05
    params = {
        "w_enc": scale * jax.random.normal(k_we, (E, H), dtype=jnp.float32),
        "b_enc": scale * jax.random.normal(k_be, (1, H), dtype=jnp.float32),
        "w_dec": scale * jax.random.normal(k_wd, (D, H), dtype=jnp.float32),
        "w_v":   scale * jax.random.normal(k_wv, (H, 1), dtype=jnp.float32),
        "b_w":   scale * jax.random.normal(k_bw, (1, 1), dtype=jnp.float32),
    }

    ctx, attw = bahdanau_attention(encoder_outs, src_lens, decoder_state, params)
    ctx = jax.block_until_ready(ctx)
    attw = jax.block_until_ready(attw)

    ctx_ref, attw_ref = reference(encoder_outs, src_lens, decoder_state, params)
    assert ctx.shape == (B, E) and attw.shape == (B, T)
    # bf16 matmul inputs + approx reciprocal -> compare against f32 reference with
    # a relaxed tolerance.
    assert jnp.allclose(ctx, ctx_ref, atol=2e-2, rtol=2e-2)
    assert jnp.allclose(attw, attw_ref, atol=2e-2, rtol=2e-2)

    print("KERNEL_OK")
</pallas_src>

<mosaic_0001>
module attributes {stable_mosaic.version = 11 : i64} {
  func.func @_bahdanau_kernel(%arg0: i32, %arg1: memref<2xi32, #tpu.memory_space<smem>>, %arg2: memref<16x128xbf16, #tpu.memory_space<vmem>>, %arg3: memref<1x1x128xbf16, #tpu.memory_space<vmem>>, %arg4: memref<128x128xbf16, #tpu.memory_space<vmem>>, %arg5: memref<1x128xf32, #tpu.memory_space<vmem>>, %arg6: memref<128x128xbf16, #tpu.memory_space<vmem>>, %arg7: memref<1x128xf32, #tpu.memory_space<vmem>>, %arg8: memref<1x1xf32, #tpu.memory_space<smem>>, %arg9: memref<1x1x128xf32, #tpu.memory_space<vmem>>, %arg10: memref<1x1x16xf32, #tpu.memory_space<vmem>>) attributes {dimension_semantics = [#tpu.dimension_semantics<parallel>], iteration_bounds = array<i64: 2>, scalar_prefetch = 1 : i64, scratch_operands = 0 : i64, tpu.core_type = #tpu.core_type<tc>, window_params = [{transform_indices = @transform_0, window_bounds = array<i64: 16, 128>}, {transform_indices = @transform_1, window_bounds = array<i64: 1, 1, 128>}, {pipeline_mode = #tpu.pipeline_mode<synchronous>, transform_indices = @transform_2, window_bounds = array<i64: 128, 128>}, {pipeline_mode = #tpu.pipeline_mode<synchronous>, transform_indices = @transform_3, window_bounds = array<i64: 1, 128>}, {pipeline_mode = #tpu.pipeline_mode<synchronous>, transform_indices = @transform_4, window_bounds = array<i64: 128, 128>}, {pipeline_mode = #tpu.pipeline_mode<synchronous>, transform_indices = @transform_5, window_bounds = array<i64: 1, 128>}, {transform_indices = @transform_6, window_bounds = array<i64: 1, 1>}, {transform_indices = @transform_7, window_bounds = array<i64: 1, 1, 128>}, {transform_indices = @transform_8, window_bounds = array<i64: 1, 1, 16>}]} {
    %c1_i32 = arith.constant 1 : i32
    %0 = arith.muli %arg0, %c1_i32 : i32
    %c0 = arith.constant 0 : index
    %c0_0 = arith.constant 0 : index
    %1 = vector.load %arg2[%c0, %c0_0] : memref<16x128xbf16, #tpu.memory_space<vmem>>, vector<16x128xbf16>
    %c0_1 = arith.constant 0 : index
    %c0_2 = arith.constant 0 : index
    %2 = vector.load %arg4[%c0_1, %c0_2] : memref<128x128xbf16, #tpu.memory_space<vmem>>, vector<128x128xbf16>
    %cst = arith.constant dense<0.000000e+00> : vector<16x128xf32>
    %3 = tpu.matmul %1, %2, %cst {dimension_numbers = #tpu.dot_dimension_numbers<[1], [0], [0], [1], [0, 0, 1, 1], [], []>} : vector<16x128xbf16>, vector<128x128xbf16>, vector<16x128xf32> -> vector<16x128xf32>
    %c0_3 = arith.constant 0 : index
    %c0_4 = arith.constant 0 : index
    %4 = vector.load %arg5[%c0_3, %c0_4] : memref<1x128xf32, #tpu.memory_space<vmem>>, vector<1x128xf32>
    %5 = vector.broadcast %4 : vector<1x128xf32> to vector<16x128xf32>
    %6 = arith.addf %3, %5 : vector<16x128xf32>
    %c0_5 = arith.constant 0 : index
    %c0_6 = arith.constant 0 : index
    %7 = vector.load %arg7[%c0_5, %c0_6] : memref<1x128xf32, #tpu.memory_space<vmem>>, vector<1x128xf32>
    %c0_7 = arith.constant 0 : index
    %c0_8 = arith.constant 0 : index
    %8 = memref.load %arg8[%c0_7, %c0_8] : memref<1x1xf32, #tpu.memory_space<smem>>
    %9 = tpu.iota {dimensions = array<i32: 1>} : vector<1x16xi32>
    %c0_9 = arith.constant 0 : index
    %c0_10 = arith.constant 0 : index
    %c0_11 = arith.constant 0 : index
    %10 = vector.load %arg3[%c0_9, %c0_10, %c0_11] : memref<1x1x128xbf16, #tpu.memory_space<vmem>>, vector<1x1x128xbf16>
    %11 = vector.shape_cast %10 : vector<1x1x128xbf16> to vector<1x128xbf16>
    %c0_12 = arith.constant 0 : index
    %c0_13 = arith.constant 0 : index
    %12 = vector.load %arg6[%c0_12, %c0_13] : memref<128x128xbf16, #tpu.memory_space<vmem>>, vector<128x128xbf16>
    %cst_14 = arith.constant dense<0.000000e+00> : vector<1x128xf32>
    %13 = tpu.matmul %11, %12, %cst_14 {dimension_numbers = #tpu.dot_dimension_numbers<[1], [0], [0], [1], [0, 0, 1, 1], [], []>} : vector<1x128xbf16>, vector<128x128xbf16>, vector<1x128xf32> -> vector<1x128xf32>
    %14 = vector.broadcast %13 : vector<1x128xf32> to vector<16x128xf32>
    %15 = arith.addf %6, %14 : vector<16x128xf32>
    %16 = math.tanh %15 : vector<16x128xf32>
    "tpu.trace_start"() <{level = 10 : i32, message = "oh,th->ot"}> : () -> ()
    %cst_15 = arith.constant dense<0.000000e+00> : vector<1x16xf32>
    %17 = tpu.matmul %7, %16, %cst_15 {dimension_numbers = #tpu.dot_dimension_numbers<[1], [1], [0], [0], [0, 0, 1, 0], [], []>} : vector<1x128xf32>, vector<16x128xf32>, vector<1x16xf32> -> vector<1x16xf32>
    "tpu.trace_stop"() : () -> ()
    %18 = vector.broadcast %8 : f32 to vector<1x16xf32>
    %19 = arith.addf %17, %18 : vector<1x16xf32>
    %c0_i32 = arith.constant 0 : i32
    %20 = arith.addi %0, %c0_i32 : i32
    %21 = arith.index_cast %20 : i32 to index
    %22 = memref.load %arg1[%21] : memref<2xi32, #tpu.memory_space<smem>>
    %23 = vector.broadcast %22 : i32 to vector<1x16xi32>
    %24 = arith.cmpi sge, %9, %23 : vector<1x16xi32>
    %cst_16 = arith.constant -1.000000e+30 : f32
    %25 = vector.broadcast %cst_16 : f32 to vector<1x16xf32>
    %26 = arith.select %24, %25, %19 : vector<1x16xi1>, vector<1x16xf32>
    %cst_17 = arith.constant dense<0xFF800000> : vector<1xf32>
    %27 = vector.multi_reduction <maximumf>, %26, %cst_17 [1] : vector<1x16xf32> to vector<1xf32>
    %28 = vector.shape_cast %27 : vector<1xf32> to vector<1x1xf32>
    %29 = vector.broadcast %28 : vector<1x1xf32> to vector<1x16xf32>
    %30 = arith.subf %26, %29 : vector<1x16xf32>
    %31 = math.exp %30 : vector<1x16xf32>
    %cst_18 = arith.constant dense<0.000000e+00> : vector<1xf32>
    %32 = vector.multi_reduction <add>, %31, %cst_18 [1] : vector<1x16xf32> to vector<1xf32>
    %33 = vector.shape_cast %32 : vector<1xf32> to vector<1x1xf32>
    %34 = tpu.reciprocal %33 {approx = true} : vector<1x1xf32> -> vector<1x1xf32>
    %35 = vector.broadcast %34 : vector<1x1xf32> to vector<1x16xf32>
    %36 = arith.mulf %31, %35 : vector<1x16xf32>
    %37 = arith.truncf %36 : vector<1x16xf32> to vector<1x16xbf16>
    %cst_19 = arith.constant dense<0.000000e+00> : vector<1x128xf32>
    %38 = tpu.matmul %37, %1, %cst_19 {dimension_numbers = #tpu.dot_dimension_numbers<[1], [0], [0], [1], [0, 0, 1, 1], [], []>} : vector<1x16xbf16>, vector<16x128xbf16>, vector<1x128xf32> -> vector<1x128xf32>
    %c0_20 = arith.constant 0 : index
    %c0_21 = arith.constant 0 : index
    %c0_22 = arith.constant 0 : index
    %39 = vector.load %arg9[%c0_20, %c0_21, %c0_22] : memref<1x1x128xf32, #tpu.memory_space<vmem>>, vector<1x1x128xf32>
    %40 = vector.shape_cast %39 : vector<1x1x128xf32> to vector<1x128xf32>
    %41 = vector.shape_cast %38 : vector<1x128xf32> to vector<1x1x128xf32>
    tpu.vector_store %arg9[%c0_20, %c0_21, %c0_22], %41 {strides = array<i32>} : memref<1x1x128xf32, #tpu.memory_space<vmem>>, vector<1x1x128xf32>,
    %c0_23 = arith.constant 0 : index
    %c0_24 = arith.constant 0 : index
    %c0_25 = arith.constant 0 : index
    %42 = vector.load %arg10[%c0_23, %c0_24, %c0_25] : memref<1x1x16xf32, #tpu.memory_space<vmem>>, vector<1x1x16xf32>
    %43 = vector.shape_cast %42 : vector<1x1x16xf32> to vector<1x16xf32>
    %44 = vector.shape_cast %36 : vector<1x16xf32> to vector<1x1x16xf32>
    tpu.vector_store %arg10[%c0_23, %c0_24, %c0_25], %44 {strides = array<i32>} : memref<1x1x16xf32, #tpu.memory_space<vmem>>, vector<1x1x16xf32>,
    return
  }
  func.func @transform_0(%arg0: i32, %arg1: memref<2xi32, #tpu.memory_space<smem>>) -> (i32, i32) {
    %c0_i32 = arith.constant 0 : i32
    %c0_i32_0 = arith.constant 0 : i32
    return %arg0, %c0_i32 : i32, i32
  }
  func.func @transform_1(%arg0: i32, %arg1: memref<2xi32, #tpu.memory_space<smem>>) -> (i32, i32, i32) {
    %c0_i32 = arith.constant 0 : i32
    %c0_i32_0 = arith.constant 0 : i32
    %c0_i32_1 = arith.constant 0 : i32
    return %arg0, %c0_i32, %c0_i32_0 : i32, i32, i32
  }
  func.func @transform_2(%arg0: i32, %arg1: memref<2xi32, #tpu.memory_space<smem>>) -> (i32, i32) {
    %c0_i32 = arith.constant 0 : i32
    %c0_i32_0 = arith.constant 0 : i32
    %c0_i32_1 = arith.constant 0 : i32
    return %c0_i32, %c0_i32_0 : i32, i32
  }
  func.func @transform_3(%arg0: i32, %arg1: memref<2xi32, #tpu.memory_space<smem>>) -> (i32, i32) {
    %c0_i32 = arith.constant 0 : i32
    %c0_i32_0 = arith.constant 0 : i32
    %c0_i32_1 = arith.constant 0 : i32
    return %c0_i32, %c0_i32_0 : i32, i32
  }
  func.func @transform_4(%arg0: i32, %arg1: memref<2xi32, #tpu.memory_space<smem>>) -> (i32, i32) {
    %c0_i32 = arith.constant 0 : i32
    %c0_i32_0 = arith.constant 0 : i32
    %c0_i32_1 = arith.constant 0 : i32
    return %c0_i32, %c0_i32_0 : i32, i32
  }
  func.func @transform_5(%arg0: i32, %arg1: memref<2xi32, #tpu.memory_space<smem>>) -> (i32, i32) {
    %c0_i32 = arith.constant 0 : i32
    %c0_i32_0 = arith.constant 0 : i32
    %c0_i32_1 = arith.constant 0 : i32
    return %c0_i32, %c0_i32_0 : i32, i32
  }
  func.func @transform_6(%arg0: i32, %arg1: memref<2xi32, #tpu.memory_space<smem>>) -> (i32, i32) {
    %c0_i32 = arith.constant 0 : i32
    %c0_i32_0 = arith.constant 0 : i32
    %c0_i32_1 = arith.constant 0 : i32
    return %c0_i32, %c0_i32_0 : i32, i32
  }
  func.func @transform_7(%arg0: i32, %arg1: memref<2xi32, #tpu.memory_space<smem>>) -> (i32, i32, i32) {
    %c0_i32 = arith.constant 0 : i32
    %c0_i32_0 = arith.constant 0 : i32
    %c0_i32_1 = arith.constant 0 : i32
    return %arg0, %c0_i32, %c0_i32_0 : i32, i32, i32
  }
  func.func @transform_8(%arg0: i32, %arg1: memref<2xi32, #tpu.memory_space<smem>>) -> (i32, i32, i32) {
    %c0_i32 = arith.constant 0 : i32
    %c0_i32_0 = arith.constant 0 : i32
    %c0_i32_1 = arith.constant 0 : i32
    return %arg0, %c0_i32, %c0_i32_0 : i32, i32, i32
  }
}

</mosaic_0001>

<bundles_post_ra>
// kernel: tpu_custom_call.1
= control target key start
LH: loop header
LB: loop body
LE: loop exit
PB: predicated region body
PF: predicated region fallthrough
CT: control target
= control target key end

     0   :  { %s1645_s0 = inlined_call_operand.vmem [shape: s32[2], index: 0, kind: input, shape index: {}]   ;;  %s1646_s1 = inlined_call_operand.hbm [shape: bf16[32,128], index: 1, kind: input, shape index: {}]   ;;  %s1647_s2 = inlined_call_operand.vmem [shape: bf16[2,1,128], index: 2, kind: input, shape index: {}]   ;;  %s1648_s3 = inlined_call_operand.hbm [shape: bf16[128,128], index: 3, kind: input, shape index: {}]   ;;  %s1649_s4 = inlined_call_operand.vmem [shape: f32[1,128], index: 4, kind: input, shape index: {}]   ;;  %s1650_s5 = inlined_call_operand.hbm [shape: bf16[128,128], index: 5, kind: input, shape index: {}]   ;;  %s1651_s6 = inlined_call_operand.vmem [shape: f32[1,128], index: 6, kind: input, shape index: {}]   ;;  %s1652_s7 = inlined_call_operand.<no memory space> [shape: f32[1,1], index: 7, kind: input, shape index: {}]   ;;  %s1653_s8 = inlined_call_operand.hbm [shape: f32[2,1,128], index: 8, kind: output, shape index: {0}]   ;;  %s1654_s9 = inlined_call_operand.hbm [shape: f32[2,1,16], index: 9, kind: output, shape index: {1}]  }
   0x1   :  { %1661 = sst [smem:[#allocation19_spill]] %s1648_s3  ;;  %s15_s11 = sshll.u32 %s1645_s0, 4  ;;  %s16_s11 = int_to_ptr.vmem [resolvable:$true] %s15_s11 }
   0x2   :  { %19 = sst [smem:[#allocation4]] %s1652_s7  ;;  %s1123_s14 = scalar_lea.vmem %s16_s11, 16 }
   0x3   :  { %p1124_p0 = scmp.ne.s32.totalorder %s16_s11, %s1123_s14  ;;  %p1128_p1 = scmp.lt.s32.totalorder %s16_s11, %s16_s11 }
   0x4   :  { %p1129_p2 = scmp.lt.s32.totalorder %s1123_s14, %s1123_s14 }
   0x6   :  { %p1130_p3 = por %p1129_p2, %p1128_p1 }
   0x8   :  { %p1131_p4 = pnand %p1130_p3, %p1124_p0 }
   0xa   :  { %1134 = shalt.err (!%p1131_p4)  }
   0xb   :  { %s1317_s15 = smov [#allocation3]  }
   0xc   :  { %18 = dma.vmem_to_smem %s16_s11, 16, %s1317_s15, [#allocation2] }
   0xd   :  { %1283 = dma.done.wait [#allocation2], 16 }
   0xe   :  { %1284 = vsyncadd [#allocation2], 4294967280 }
   0xf   :  { %21 = sfence }
  0x10   :  { %22 = vsyncpa [#allocation6], 0 }
  0x11   :  { %24 = vsyncpa [#allocation6 + $0x1], 0 }
  0x12   :  { %25 = vsyncpa [#allocation9], 0 }
  0x13   :  { %26 = vsyncpa [#allocation7], 0 }
  0x14   :  { %28 = vsyncpa [#allocation7 + $0x1], 0 }
  0x15   :  { %29 = vsyncpa [#allocation13], 0 }
  0x16   :  { %31 = vsyncpa [#allocation13 + $0x1], 0  ;;  %s1383_s0 = smov 0   ;;  %s1385_s7 = smov 0  }
  0x17   :  { %s1387_s16 = smov 0   ;;  %s1389_s17 = smov 0  }
  0x18 LB: > { %s1404_s18 = sadd.s32 4294967295, %s1315_s17   ;;  %s909_s19 = sadd.s32 4294967294, %s1315_s17   ;;  %s1315_s17 = sphi %s1389_s17, %s1681_s17   ;;  %s1311_s16 = sphi %s1387_s16, %s1680_s16   ;;  %s1307_s7 = sphi %s1385_s7, %s1679_s7   ;;  %s1303_s0 = sphi %s1383_s0, %s1678_s0  }
  0x19   : > { %p57_p5 = scmp.ne.s32.totalorder %s1307_s7, %s1303_s0  ;;  %p1656_p6 = scmp.eq.s32.totalorder %s1404_s18, 0 }
  0x1a   : > { %p212_p7 = scmp.eq.s32.totalorder %s1404_s18, 1  ;;  %p218_p8 = scmp.eq.s32.totalorder %s909_s19, 1 }
  0x1b   : > { %p1413_p9 = por %p1656_p6, %p57_p5  ;;  %p910_p10 = scmp.ge.s32.totalorder %s1315_s17, 1 }
  0x1c   : > { %p1418_p11 = por %p218_p8, %p57_p5  ;;  %p251_p12 = scmp.lt.s32.totalorder %s1315_s17, 3 }
  0x1d   : > { %s1662_s20 = scalar_select %p1413_p9, 1, 0 }
  0x1e   : > { %s1663_s21 = scalar_select %p1418_p11, 1, 0 }
  0x1f   : > { %p1423_p13 = pnand %p910_p10, %p251_p12  ;;  %s1318_s23 = smov [#allocation8]  }
  0x20   : > { %s263_s24 = sshll.u32 %s1318_s23, 4  ;;  %s1319_s26 = smov [#allocation10]   ;;  %s264_s24 = int_to_ptr.vmem [resolvable:$true] %s263_s24 }
  0x21   : > { %s1664_s22 = scalar_select %p1423_p13, 1, 0 }
  0x22   : > { %p1035_p0 = pneg %p1423_p13  ;;  %s279_s27 = sshll.u32 %s1319_s26, 4  ;;  %s280_s27 = int_to_ptr.vmem [resolvable:$true] %s279_s27 }
  0x23   : > { %s1146_s28 = scalar_lea.vmem %s264_s24, 1024  ;;  %p1154_p10 = scmp.lt.s32.totalorder %s264_s24, %s264_s24 }
  0x24   : > { %p1432_p2 = pnand %p1035_p0, %p1656_p6  ;;  %p1147_p4 = scmp.ne.s32.totalorder %s264_s24, %s1146_s28 }
  0x25   : > { %p1155_p12 = scmp.lt.s32.totalorder %s1146_s28, %s1146_s28 }
  0x26   : > { %p1137_p3 = pneg %p1432_p2 }
  0x27   : > { %p1156_p1 = por %p1155_p12, %p1154_p10 }
  0x28   : > { %p1149_p5 = pnand %p1147_p4, %p1137_p3 }
  0x2a   : > { %p1150_p8 = pneg %p1149_p5 }
  0x2c   : > { %p1157_p0 = pnand %p1156_p1, %p1150_p8 }
  0x2e   : > { %1160 = shalt.err (!%p1157_p0)
}
  0x2f   : > { %s1655_s29 = smov 64   ;;  %s1657_s30 = smov 4  }
  0x30   : > { %s1666_s3 = sld [smem:[#allocation19_spill]]  ;;  %s1172_s12 = scalar_lea.vmem %s280_s27, 1024 }
  0x31   : > { %p1173_p4 = scmp.ne.s32.totalorder %s280_s27, %s1172_s12  ;;  %p1180_p1 = scmp.lt.s32.totalorder %s280_s27, %s280_s27 }
  0x32   : > { %p1181_p8 = scmp.lt.s32.totalorder %s1172_s12, %s1172_s12 }
  0x33   : > { %p1175_p5 = pnand %p1173_p4, %p1137_p3 }
  0x34   : > { %p1182_p12 = por %p1181_p8, %p1180_p1 }
  0x35   : > { %p1176_p10 = pneg %p1175_p5 }
  0x36   : > { %1038 = dma.hbm_to_vmem [thread:$0]  (!%p1432_p2), %s1666_s3, 1024, %s264_s24, [#allocation9], %s1655_s29, %s1655_s29, %s1657_s30  }
  0x37   : > { %p1183_p0 = pnand %p1182_p12, %p1176_p10 }
  0x39   : > { %1186 = shalt.err (!%p1183_p0)
}
  0x3a   : > { %1041 = dma.hbm_to_vmem [thread:$0]  (!%p1432_p2), %s1650_s5, 1024, %s280_s27, [#allocation9], %s1655_s29, %s1655_s29, %s1657_s30  }
  0x3b   : > { %s1461_s15 = sadd.s32 1, %s1315_s17   ;;  %s44_s19 = sadd.s32 1, %s1311_s16 }
  0x3c   : > { %s41_s23 = ssub.s32 %s1315_s17, %s1461_s15  ;;  %p51_p3 = scmp.ne.s32.totalorder %s1311_s16, %s1307_s7 }
  0x3d   : > { %p42_p4 = scmp.eq.s32.totalorder %s41_s23, 0  ;;  %p52_p5 = scmp.eq.s32.totalorder %s1315_s17, 0 }
  0x3e   : > { %p1471_p10 = por %p212_p7, %p51_p3  ;;  %p1055_p1 = scmp.lt.s32.totalorder %s1315_s17, 2 }
  0x3f   : > { %s1477_s25 = scalar_select %p42_p4, %s1311_s16, %s44_s19  }
  0x40   : > { %s1667_s24 = scalar_select %p1471_p10, 1, 0 }
  0x41   : > { %p53_p8 = por %p52_p5, %p51_p3  ;;  %s299_s26 = sand.u32 1, %s1311_s16  }
  0x42   : > { %s914_s28 = sshll.u32 %s299_s26, 3  ;;  %s944_s27 = sshll.u32 %s1315_s17, 7 }
  0x43   : > { %s1484_s12 = scalar_lea.hbm %s1646_s1, %s944_s27  ;;  %s303_s13 = scalar_lea.vmem [#allocation5], %s914_s28 }
  0x44   : > { %s310_s14 = sshll.u32 %s303_s13, 4  ;;  %p1488_p7 = pnand %p1055_p1, %p53_p8  ;;  %s1486_s14 = int_to_ptr.vmem [resolvable:$true] %s310_s14 }
  0x45   : > { %s1492_s19 = scalar_lea.sflag [#allocation6], %s299_s26  ;;  %s1187_s29 = scalar_lea.hbm %s1484_s12, 128 }
  0x46   : > { %p1188_p2 = scmp.ne.s32.totalorder %s1484_s12, %s1187_s29  ;;  %p1189_p12 = pneg %p1488_p7 }
  0x47   : > { %s1192_s28 = scalar_lea.hbm %s1646_s1, 256  ;;  %p1193_p4 = scmp.lt.s32.totalorder %s1484_s12, %s1646_s1 }
  0x48   : > { %p1190_p0 = pnand %p1189_p12, %p1188_p2  ;;  %p1194_p5 = scmp.lt.s32.totalorder %s1192_s28, %s1187_s29 }
  0x4a   : > { %p1191_p3 = pneg %p1190_p0  ;;  %p1195_p1 = por %p1194_p5, %p1193_p4 }
  0x4c   : > { %p1196_p8 = pnand %p1195_p1, %p1191_p3 }
  0x4e   : > { %1199 = shalt.err (!%p1196_p8)
}
  0x4f   : > { %s1200_s26 = scalar_lea.vmem %s1486_s14, 128  ;;  %s1322_s30 = smov [#allocation5]  }
  0x50   : > { %p1201_p6 = scmp.ne.s32.totalorder %s1486_s14, %s1200_s26  ;;  %s1205_s3 = sshll.u32 %s1322_s30, 4  ;;  %s1206_s3 = int_to_ptr.vmem [resolvable:$false] %s1205_s3 }
  0x51   : > { %s1207_s27 = scalar_lea.vmem %s1206_s3, 256  ;;  %p1208_p0 = scmp.lt.s32.totalorder %s1486_s14, %s1206_s3 }
  0x52   : > { %p1203_p11 = pnand %p1201_p6, %p1189_p12  ;;  %p1209_p10 = scmp.lt.s32.totalorder %s1207_s27, %s1200_s26 }
  0x54   : > { %p1204_p2 = pneg %p1203_p11  ;;  %p1210_p9 = por %p1209_p10, %p1208_p0 }
  0x56   : > { %p1211_p13 = pnand %p1210_p9, %p1204_p2 }
  0x58   : > { %1214 = shalt.err (!%p1211_p13)
}
  0x59   : > { %s1669_s29 = smov 4   ;;  %s1670_s10 = smov 64  }
  0x5a   : > { %1045 = dma.hbm_to_vmem [thread:$0]  (!%p1488_p7), %s1484_s12, 128, %s1486_s14, %s1492_s19, %s1670_s10, %s1670_s10, %s1669_s29  }
  0x5b   : > { %p1671_p6 = scmp.ne.s32.totalorder %s1664_s22, 0 }
  0x5c   : > { %s1519_s30 = sand.u32 (!%p1671_p6), 1, %s1307_s7   ;;  %p1672_p9 = scmp.ne.s32.totalorder (!%p1671_p6), %s1662_s20, 0 }
  0x5d   : > { %328 = sbr.rel (%p1671_p6) target bundleno = 1077 (0x435), region = 48  ;;  %s918_s3 = sshll.u32 (!%p1671_p6), %s1519_s30, 3 }
  0x5e   : > { %s331_s28 = scalar_lea.sflag (!%p1671_p6), [#allocation6], %s1519_s30  ;;  %s1523_s11 = scalar_lea.vmem (!%p1671_p6), [#allocation5], %s918_s3 }
  0x62   : > { %1286 = dma.done.wait (%p1672_p9), %s331_s28, 128  }
  0x63   : > { %1288 = vsyncadd (%p1672_p9), %s331_s28, 4294967168  ;;  %p1673_p11 = scmp.eq.s32.totalorder %s1404_s18, 0 }
  0x65   : > { %1290 = dma.done.wait (%p1673_p11), [#allocation9], 2048   ;;  %p1674_p13 = pmov %p1673_p11 }
  0x66   : > { %v1323_v0 = vmov 0.0   ;;  %vm1324_vm0 = vmmov 0   ;;  %v1098_v1 = vld [vmem:[#allocation8 + $0x38] sm:$0xff]   ;;  %v1100_v3 = vld [vmem:[#allocation8 + $0x30] sm:$0xff]   ;;  %v1102_v5 = vld [vmem:[#allocation8 + $0x28] sm:$0xff]   ;;  %p382_p10 = scmp.lt.s32.totalorder %s1404_s18, 1  ;;  %v508_v19 = vlaneseq }
  0x67   : > { %1292 = vsyncadd (%p1674_p13), [#allocation9], 4294965248  ;;  %968 = vmatprep.subr.bf16.mxu0 %v1323_v0  ;;  %988 = vmatprep.subr.bf16.mxu1 %v1323_v0  ;;  %v1099_v2 = vld [vmem:[#allocation10 + $0x38] sm:$0xff]   ;;  %v1101_v4 = vld [vmem:[#allocation10 + $0x30] sm:$0xff]   ;;  %s694_s27 = sld [smem:[#allocation3 + %s1404_s18]]  ;;  %vm698_vm2 = vcmask 122880  }
  0x68   : > { %984 = vmatprep.mubr.msk.bf16.mxu0 %vm1324_vm0, %v1323_v0  ;;  %1004 = vmatprep.mubr.msk.bf16.mxu1 %vm1324_vm0, %v1323_v0  ;;  %v1103_v6 = vld [vmem:[#allocation10 + $0x28] sm:$0xff]   ;;  %v1104_v7 = vld [vmem:[#allocation8 + $0x20] sm:$0xff]   ;;  %v1106_v9 = vld [vmem:[#allocation8 + $0x18] sm:$0xff]   ;;  %s383_s20 = scalar_select %p382_p10, %s1404_s18, 1  ;;  %v616_v20 = vshrl.u32 %v508_v19, 7  ;;  %v509_v39 = vand.u32 127, %v508_v19 }
  0x69   : > { %969 = vmatpush3.bf16.msra.mxu0 %v1098_v1  ;;  %989 = vmatpush3.bf16.msra.mxu1 %v1099_v2  ;;  %v1105_v8 = vld [vmem:[#allocation10 + $0x20] sm:$0xff]   ;;  %v1107_v10 = vld [vmem:[#allocation10 + $0x18] sm:$0xff]   ;;  %v1108_v11 = vld [vmem:[#allocation8 + $0x10] sm:$0xff]   ;;  %s507_s29 = sld [smem:[#allocation4]]  ;;  %vm711_vm3 = vcmask 130048   ;;  %s380_s10 = scalar_lea.vmem [#allocation12], %s1519_s30 }
  0x6a   : > { %970 = vmatprep.subr.bf16.mxu0 %v1323_v0  ;;  %990 = vmatprep.subr.bf16.mxu1 %v1323_v0  ;;  %v1109_v12 = vld [vmem:[#allocation10 + $0x10] sm:$0xff]   ;;  %v1110_v13 = vld [vmem:[#allocation8 + $0x8] sm:$0xff]   ;;  %v1112_v15 = vld [vmem:[#allocation8] sm:$0xff]   ;;  %s384_s14 = scalar_lea.vmem %s1647_s2, %s383_s20  ;;  %v617_v23 = vsub.s32 0, %v616_v20  ;;  %s940_s3 = sshll.u32 %s1404_s18, 4 }
  0x6b   : > { %v1111_v14 = vld [vmem:[#allocation10 + $0x8] sm:$0xff]   ;;  %v1113_v16 = vld [vmem:[#allocation10] sm:$0xff]   ;;  %v1114_v17 = vld [vmem:[%s1523_s11] sm:$0xff]   ;;  %s787_s28 = sshll.u32 %s380_s10, 4  ;;  %s785_s22 = scalar_lea.hbm %s1654_s9, %s940_s3  ;;  %s788_s28 = int_to_ptr.vmem [resolvable:$true] %s787_s28 }
  0x6c   : > { %v510_v18 = vld [vmem:[%s384_s14] sm:$0x1]  ;;  %s762_s12 = scalar_lea.sflag [#allocation13], %s1519_s30  ;;  %s1215_s14 = scalar_lea.vmem %s788_s28, 16 }
  0x6d   : > { %971 = vmatpush3.bf16.msra.mxu0 %v1100_v3  ;;  %991 = vmatpush3.bf16.msra.mxu1 %v1101_v4  ;;  %v921_v24 = vld [vmem:[%s1649_s4] ss:$0 sm:$0xff]  ;;  %v695_v40 = vstv %s694_s27  ;;  %p1216_p7 = scmp.ne.s32.totalorder %s788_s28, %s1215_s14  ;;  %p1675_p12 = scmp.ne.s32.totalorder %s1667_s24, 0 }
  0x6e   : > { %972 = vmatprep.subr.bf16.mxu0 %v1323_v0  ;;  %992 = vmatprep.subr.bf16.mxu1 %v1323_v0  ;;  %v506_v38 = vld [vmem:[%s1651_s6] sm:$0x1]  ;;  %vm696_vm1 = vcmp.ge.s32.totalorder %v509_v39, %v695_v40  ;;  %s1325_s23 = smov [#allocation12]  }
  0x6f   : > { %v623_v41 = vstv %s507_s29  ;;  %p1217_p3 = pnand %p1216_p7, %p1675_p12  ;;  %s1219_s19 = sshll.u32 %s1325_s23, 4  ;;  %s1220_s19 = int_to_ptr.vmem [resolvable:$false] %s1219_s19 }
  0x70   : > { %s1221_s13 = scalar_lea.vmem %s1220_s19, 32  ;;  %p1222_p5 = scmp.lt.s32.totalorder %s788_s28, %s1220_s19 }
  0x71   : > { %973 = vmatpush3.bf16.msra.mxu0 %v1102_v5  ;;  %993 = vmatpush3.bf16.msra.mxu1 %v1103_v6  ;;  %p1218_p4 = pneg %p1217_p3  ;;  %p1223_p1 = scmp.lt.s32.totalorder %s1221_s13, %s1215_s14 }
  0x72   : > { %974 = vmatprep.subr.bf16.mxu0 %v1323_v0  ;;  %994 = vmatprep.subr.bf16.mxu1 %v1323_v0 }
  0x73   : > { %p1224_p8 = por %p1223_p1, %p1222_p5 }
  0x75   : > { %975 = vmatpush3.bf16.msra.mxu0 %v1104_v7  ;;  %995 = vmatpush3.bf16.msra.mxu1 %v1105_v8  ;;  %p1225_p2 = pnand %p1224_p8, %p1218_p4 }
  0x76   : > { %976 = vmatprep.subr.bf16.mxu0 %v1323_v0  ;;  %996 = vmatprep.subr.bf16.mxu1 %v1323_v0 }
  0x79   : > { %977 = vmatpush3.bf16.msra.mxu0 %v1106_v9  ;;  %997 = vmatpush3.bf16.msra.mxu1 %v1107_v10 }
  0x7a   : > { %978 = vmatprep.subr.bf16.mxu0 %v1323_v0  ;;  %998 = vmatprep.subr.bf16.mxu1 %v1323_v0 }
  0x7d   : > { %979 = vmatpush3.bf16.msra.mxu0 %v1108_v11  ;;  %999 = vmatpush3.bf16.msra.mxu1 %v1109_v12 }
  0x7e   : > { %980 = vmatprep.subr.bf16.mxu0 %v1323_v0  ;;  %1000 = vmatprep.subr.bf16.mxu1 %v1323_v0 }
  0x81   : > { %981 = vmatpush3.bf16.msra.mxu0 %v1110_v13  ;;  %1001 = vmatpush3.bf16.msra.mxu1 %v1111_v14 }
  0x82   : > { %982 = vmatprep.subr.bf16.mxu0 %v1323_v0  ;;  %1002 = vmatprep.subr.bf16.mxu1 %v1323_v0 }
  0x85   : > { %983 = vmatpush3.bf16.msra.mxu0 %v1112_v15  ;;  %1003 = vmatpush3.bf16.msra.mxu1 %v1113_v16 }
  0x86   : > { %1008 = vmatprep.subr.mxu0 %v1323_v0  ;;  %1015 = vmatprep.subr.bf16.mxu1 %v1323_v0 }
  0x88   : > { %985 = vmatmul.mubr.bf16.vlgmr.msra.gmra.mxu0 %v1114_v17  ;;  %1005 = vmatmul.mubr.bf16.vlgmr.msra.gmra.mxu1 %v510_v18 }
  0x89   : > { %1012 = vmatprep.mubr.msk.f32.mxu0 %vm1324_vm0, %v1323_v0  ;;  %1016 = vmatpush3.bf16.msra.mxu1 %v1114_v17 }
  0x8a   : > { %1017 = vmatprep.mubr.msk.bf16.mxu1 %vm1324_vm0, %v1323_v0 }
 0x148   : > { %v499_v21 = vpop.f32.mrf.mxu0  ;;  %v609_v22 = vpop.f32.mrf.mxu1 }
 0x149   : > { %v500_v28 = vadd.f32 %v921_v24, %v499_v21  ;;  %v618_v29 = vrot.slane %v609_v22, %v617_v23 }
 0x14a   : > { %v986_v25 = vpop.f32.mrf.mxu0  ;;  %v1006_v26 = vpop.f32.mrf.mxu1 }
 0x14b   : > { %v619_v35 = vadd.f32 %v618_v29, %v500_v28 }
 0x14c   : > { %v502_v27 = vpop.f32.mrf.mxu0  ;;  %v612_v31 = vpop.f32.mrf.mxu1 }
 0x14d   : > { %v503_v30 = vadd.f32 %v921_v24, %v502_v27 }
 0x14e   : > { %v987_v32 = vpop.f32.mrf.mxu0  ;;  %v1007_v34 = vpop.f32.mrf.mxu1 }
 0x14f   : > { %v620_v33 = vadd.f32 %v618_v29, %v503_v30 }
 0x151   : > { %1115 = vtanh.f32 %v620_v33 }
 0x152   : > { %1117 = vtanh.f32 %v619_v35 }
 0x15e   : > { %v1116_v36 = vpop.eup %1115 }
 0x15f   : > { %1009 = vmatpush3.xpose.msra.mxu0 %v1116_v36  ;;  %v1118_v37 = vpop.eup %1117 }
 0x160   : > { %1010 = vmatprep.subr.mxu0 %v1323_v0 }
 0x163   : > { %1011 = vmatpush3.xpose.msra.mxu0 %v1118_v37 }
 0x166   : > { %1013 = vmatmul.mubr.f32.vlgmr.msra.gmra.mxu0 %v506_v38 }
 0x226   : > { %v690_v42 = vpop.f32.mrf.mxu0 }
 0x227   : > { %v691_v43 = vadd.f32 %v690_v42, %v623_v41 }
 0x228   : > { %v1014_v44 = vpop.f32.mrf.mxu0 }
 0x229   : > { %v697_v45 = vsel %vm696_vm1, -1e+30, %v691_v43 }
 0x22a   : > { %v699_v46 = vsel %vm698_vm2, %v697_v45, -inf }
 0x22b   : > { %700 = vmax.xlane.f32.xlu0 %v699_v46 }
 0x2b4   : > { %v701_v47 = vpop.xlane.xlu0 %700 }
 0x2b5   : > { %v702_v48 = vsub.f32 %v697_v45, %v701_v47 }
 0x2b7   : > { %v703_v49 = vmul.f32 1.442695, %v702_v48 }
 0x2b9   : > { %1119 = vpow2.f32 %v703_v49 }
 0x2c6   : > { %v1120_v50 = vpop.eup %1119 }
 0x2c7   : > { %v705_v51 = vsel %vm698_vm2, %v1120_v50, 0.0 }
 0x2c8   : > { %706 = vadd.xlane.f32.xlu0 %v705_v51 }
 0x351   : > { %v707_v52 = vpop.xlane.xlu0 %706 }
 0x352   : > { %1121 = vrcp.f32 %v707_v52 }
 0x35f   : > { %v1122_v53 = vpop.eup %1121 }
 0x360   : > { %v709_v54 = vmul.f32 %v1122_v53, %v1120_v50 }
 0x362   : > { %v710_v55 = vpack.c.bf16 %v709_v54, %v709_v54  ;;  %756 = vst.msk [vmem:[%s380_s10] sm:$0x1] %vm698_vm2, %v709_v54 }
 0x364   : > { %1018 = vmatmul.mubr.msk.bf16.vlgmr.msra.gmra.mxu1 %vm711_vm3, %v710_v55 }
 0x365   : > { %1228 = shalt.err (!%p1225_p2)
}
 0x366   : > { %s1229_s26 = scalar_lea.hbm %s785_s22, 16  ;;  %s1233_s10 = scalar_lea.hbm %s1654_s9, 32 }
 0x367   : > { %p1230_p0 = scmp.ne.s32.totalorder %s785_s22, %s1229_s26  ;;  %p1234_p11 = scmp.lt.s32.totalorder %s785_s22, %s1654_s9 }
 0x368   : > { %p1235_p13 = scmp.lt.s32.totalorder %s1233_s10, %s1229_s26 }
 0x369   : > { %p1231_p6 = pnand %p1230_p0, %p1675_p12 }
 0x36a   : > { %p1236_p10 = por %p1235_p13, %p1234_p11 }
 0x36b   : > { %p1232_p9 = pneg %p1231_p6 }
 0x36d   : > { %p1237_p7 = pnand %p1236_p10, %p1232_p9 }
 0x36f   : > { %1240 = shalt.err (!%p1237_p7)
}
 0x370   : > { %1032 = dma.vmem_to_hbm [thread:$0]  (%p1675_p12), %s788_s28, 16, %s785_s22, %s762_s12  }
 0x371   : > { %s374_s14 = scalar_lea.vmem [#allocation11], %s1519_s30  ;;  %s1604_s26 = scalar_lea.hbm %s1653_s8, %s940_s3 }
 0x372   : > { %s774_s23 = sshll.u32 %s374_s14, 4  ;;  %s758_s27 = scalar_lea.sflag [#allocation7], %s1519_s30  ;;  %s1597_s23 = int_to_ptr.vmem [resolvable:$true] %s774_s23 }
 0x373   : > { %s1241_s29 = scalar_lea.vmem %s1597_s23, 16  ;;  %s1326_s28 = smov [#allocation11]  }
 0x374   : > { %p1242_p3 = scmp.ne.s32.totalorder %s1597_s23, %s1241_s29  ;;  %s1245_s22 = sshll.u32 %s1326_s28, 4  ;;  %s1246_s22 = int_to_ptr.vmem [resolvable:$false] %s1245_s22 }
 0x375   : > { %s1247_s18 = scalar_lea.vmem %s1246_s22, 32  ;;  %p1248_p1 = scmp.lt.s32.totalorder %s1597_s23, %s1246_s22 }
 0x376   : > { %p1243_p4 = pnand %p1242_p3, %p1675_p12  ;;  %p1249_p8 = scmp.lt.s32.totalorder %s1247_s18, %s1241_s29 }
 0x378   : > { %p1244_p5 = pneg %p1243_p4  ;;  %p1250_p2 = por %p1249_p8, %p1248_p1 }
 0x37a   : > { %p1251_p0 = pnand %p1250_p2, %p1244_p5 }
 0x424   : > { %v749_v56 = vpop.f32.mrf.mxu1 }
 0x425   : > { %755 = vst [vmem:[%s374_s14] sm:$0x1] %v749_v56 }
 0x426   : > { %v1019_v57 = vpop.f32.mrf.mxu1 }
 0x427   : > { %1254 = shalt.err (!%p1251_p0)
}
 0x428   : > { %s1255_s3 = scalar_lea.hbm %s1604_s26, 16  ;;  %s1259_s10 = scalar_lea.hbm %s1653_s8, 32 }
 0x429   : > { %p1256_p6 = scmp.ne.s32.totalorder %s1604_s26, %s1255_s3  ;;  %p1260_p13 = scmp.lt.s32.totalorder %s1604_s26, %s1653_s8 }
 0x42a   : > { %p1261_p10 = scmp.lt.s32.totalorder %s1259_s10, %s1255_s3 }
 0x42b   : > { %p1257_p9 = pnand %p1256_p6, %p1675_p12 }
 0x42c   : > { %p1262_p7 = por %p1261_p10, %p1260_p13 }
 0x42d   : > { %p1258_p11 = pneg %p1257_p9 }
 0x42f   : > { %p1263_p3 = pnand %p1262_p7, %p1258_p11 }
 0x431   : > { %1266 = shalt.err (!%p1263_p3)
}
 0x432   : > { %1031 = dma.vmem_to_hbm [thread:$0]  (%p1675_p12), %s1597_s23, 16, %s1604_s26, %s758_s27   ;;  %v752_v58 = vpop.f32.mrf.mxu1 }
 0x434   : > { %v1020_v59 = vpop.f32.mrf.mxu1 }
 0x435 PF: > { %s799_s14 = sand.u32 1, %s1303_s0   ;;  %p1676_p4 = scmp.ne.s32.totalorder %s1663_s21, 0 }
 0x436   : > { %p1677_p5 = scmp.ge.s32.totalorder %s1315_s17, 2  ;;  %s800_s19 = scalar_lea.sflag [#allocation7], %s799_s14 }
 0x438   : > { %p1047_p1 = pnand %p1677_p5, %p1676_p4 }
 0x43a   : > { %p1048_p8 = pneg %p1047_p1 }
 0x43c   : > { %1294 = dma.done.wait (%p1048_p8), %s800_s19, 16  }
 0x43d   : > { %1296 = vsyncadd (%p1048_p8), %s800_s19, 4294967280  ;;  %s808_s13 = scalar_lea.sflag [#allocation13], %s799_s14 }
 0x43e   : > { %1298 = dma.done.wait (%p1048_p8), %s808_s13, 16  }
 0x43f   : > { %1300 = vsyncadd (%p1048_p8), %s808_s13, 4294967280  ;;  %p34_p12 = scmp.ge.s32.totalorder %s1461_s15, 4   ;;  %s1678_s0 = smov %s1307_s7 }
 0x440   : > { %s1679_s7 = smov %s1311_s16  ;;  %s1680_s16 = smov %s1477_s25 }
 0x441   : > { %s1681_s17 = smov %s1461_s15  ;;  %36 = sbr.rel (!%p34_p12) target bundleno = 24 (0x18), region = 121 }
 0x446   :  { %812 = vsyncpa [#allocation6], 1 }
 0x447   :  { %814 = vsyncpa [#allocation6 + $0x1], 1 }
 0x448   :  { %815 = vsyncpa [#allocation9], 1 }
 0x449   :  { %816 = vsyncpa [#allocation7], 1 }
 0x44a   :  { %818 = vsyncpa [#allocation7 + $0x1], 1 }
 0x44b   :  { %819 = vsyncpa [#allocation13], 1 }
 0x44c   :  { %821 = vsyncpa [#allocation13 + $0x1], 1 }

</bundles_post_ra>
